<compile_context>
chip_gen: v5e
topology: v5e:2x2
jax: 0.10.0
libtpu: 0.0.40
codegen_flags: <defaults>
</compile_context>

<pallas_src>
import functools

import jax
import jax.numpy as jnp
from jax.experimental import pallas as pl
from jax.experimental.pallas import tpu as pltpu

IN_DIM = 5 + 1 + 1 + 1   # 8
H1 = 200
H2 = 50
OUT_DIM = 3
PAD_N = 128              # lane-dense padded output width

NEG_SLOPE = 1.0          # nn.LeakyReLU(True) -> negative_slope = 1.0 (identity)


def _leaky_relu(x, slope):
    return jnp.where(x >= 0, x, slope * x)


def _round_up(n, m):
    return ((n + m - 1) // m) * m


def ffnn_kernel(x_ref, w_ref, b_ref, o_ref):
    # x_ref: [TILE_B, 8], w_ref: [8, 128], b_ref: [1, 128], o_ref: [TILE_B, 128]
    y = jnp.dot(x_ref[...], w_ref[...], preferred_element_type=jnp.float32)
    o_ref[...] = (y + b_ref[...]).astype(o_ref.dtype)


@functools.partial(jax.jit, static_argnames=("tile_b",))
def ffnn_forward(x, w1, b1, w2, b2, w3, b3, *, tile_b=512):
    """x: [B, 8] float32 -> [B, 3] float32."""
    B = x.shape[0]

    # ---- fold the affine network outside the kernel (exact: slope == 1.0) ----
    w_eff = (w1 @ w2) @ w3                     # [8, 3]
    b_eff = (b1 @ w2 + b2) @ w3 + b3           # [3]

    # Pad to a lane-dense 128-wide output so stores are unmasked vst.
    w_pad = jnp.zeros((IN_DIM, PAD_N), jnp.float32).at[:, :OUT_DIM].set(w_eff)
    b_pad = jnp.zeros((1, PAD_N), jnp.float32).at[:, :OUT_DIM].set(b_eff)

    # ---- batch tiling (multiple of 8 sublanes); pad ragged batch ----
    tile_b = min(tile_b, _round_up(B, 8))
    b_padded = _round_up(B, tile_b)
    if b_padded != B:
        x = jnp.pad(x, ((0, b_padded - B), (0, 0)))

    grid = (b_padded // tile_b,)

    out = pl.pallas_call(
        ffnn_kernel,
        out_shape=jax.ShapeDtypeStruct((b_padded, PAD_N), jnp.float32),
        grid=grid,
        in_specs=[
            pl.BlockSpec((tile_b, IN_DIM), lambda i: (i, 0)),   # batch-tiled x
            pl.BlockSpec((IN_DIM, PAD_N), lambda i: (0, 0)),    # weights: VMEM-resident
            pl.BlockSpec((1, PAD_N), lambda i: (0, 0)),         # bias: VMEM-resident
        ],
        out_specs=pl.BlockSpec((tile_b, PAD_N), lambda i: (i, 0)),
        compiler_params=pltpu.CompilerParams(
            dimension_semantics=("parallel",),                  # 2-TC sharding on v7x
        ),
    )(x, w_pad, b_pad)

    return out[:B, :OUT_DIM]


def init_params(key):
    """Deterministic init mimicking nn.Linear's uniform(-1/sqrt(fan_in), ...) scheme.
    Weights are produced already transposed: [in, out]."""
    ks = jax.random.split(key, 6)

    def linear(kw, kb, fan_in, fan_out):
        bound = 1.0 / jnp.sqrt(jnp.float32(fan_in))
        w = jax.random.uniform(kw, (fan_in, fan_out), jnp.float32, -bound, bound)
        b = jax.random.uniform(kb, (fan_out,), jnp.float32, -bound, bound)
        return w, b

    w1, b1 = linear(ks[0], ks[1], IN_DIM, H1)
    w2, b2 = linear(ks[2], ks[3], H1, H2)
    w3, b3 = linear(ks[4], ks[5], H2, OUT_DIM)
    return w1, b1, w2, b2, w3, b3


def reference_forward(x, w1, b1, w2, b2, w3, b3):
    """Un-folded 3-layer reference, exactly mirroring the PyTorch forward."""
    h1 = _leaky_relu(x @ w1 + b1, NEG_SLOPE)
    h2 = _leaky_relu(h1 @ w2 + b2, NEG_SLOPE)
    return h2 @ w3 + b3


if __name__ == "__main__":
    key = jax.random.PRNGKey(0)
    kx, kp = jax.random.split(key)

    B = 16  # small, multiple of 8
    x = jax.random.normal(kx, (B, IN_DIM), jnp.float32)
    params = init_params(kp)

    out = ffnn_forward(x, *params)
    out = jax.block_until_ready(out)

    ref = reference_forward(x, *params)
    assert out.shape == (B, OUT_DIM)
    assert jnp.allclose(out, ref, atol=1e-4, rtol=1e-4), "mismatch vs reference"

    print("KERNEL_OK")
</pallas_src>

<mosaic_0001>
module attributes {stable_mosaic.version = 11 : i64} {
  func.func @ffnn_kernel(%arg0: i32, %arg1: memref<16x8xf32, #tpu.memory_space<vmem>>, %arg2: memref<8x128xf32, #tpu.memory_space<vmem>>, %arg3: memref<1x128xf32, #tpu.memory_space<vmem>>, %arg4: memref<16x128xf32, #tpu.memory_space<vmem>>) attributes {dimension_semantics = [#tpu.dimension_semantics<parallel>], iteration_bounds = array<i64: 1>, scalar_prefetch = 0 : i64, scratch_operands = 0 : i64, tpu.core_type = #tpu.core_type<tc>, window_params = [{transform_indices = @transform_0, window_bounds = array<i64: 16, 8>}, {pipeline_mode = #tpu.pipeline_mode<synchronous>, transform_indices = @transform_1, window_bounds = array<i64: 8, 128>}, {pipeline_mode = #tpu.pipeline_mode<synchronous>, transform_indices = @transform_2, window_bounds = array<i64: 1, 128>}, {transform_indices = @transform_3, window_bounds = array<i64: 16, 128>}]} {
    %c0 = arith.constant 0 : index
    %c0_0 = arith.constant 0 : index
    %0 = vector.load %arg1[%c0, %c0_0] : memref<16x8xf32, #tpu.memory_space<vmem>>, vector<16x8xf32>
    %c0_1 = arith.constant 0 : index
    %c0_2 = arith.constant 0 : index
    %1 = vector.load %arg2[%c0_1, %c0_2] : memref<8x128xf32, #tpu.memory_space<vmem>>, vector<8x128xf32>
    %cst = arith.constant dense<0.000000e+00> : vector<16x128xf32>
    %2 = tpu.matmul %0, %1, %cst {dimension_numbers = #tpu.dot_dimension_numbers<[1], [0], [0], [1], [0, 0, 1, 1], [], []>} : vector<16x8xf32>, vector<8x128xf32>, vector<16x128xf32> -> vector<16x128xf32>
    %c0_3 = arith.constant 0 : index
    %c0_4 = arith.constant 0 : index
    %3 = vector.load %arg3[%c0_3, %c0_4] : memref<1x128xf32, #tpu.memory_space<vmem>>, vector<1x128xf32>
    %4 = vector.broadcast %3 : vector<1x128xf32> to vector<16x128xf32>
    %5 = arith.addf %2, %4 : vector<16x128xf32>
    %c0_5 = arith.constant 0 : index
    %c0_6 = arith.constant 0 : index
    %6 = vector.load %arg4[%c0_5, %c0_6] : memref<16x128xf32, #tpu.memory_space<vmem>>, vector<16x128xf32>
    tpu.vector_store %arg4[%c0_5, %c0_6], %5 {strides = array<i32>} : memref<16x128xf32, #tpu.memory_space<vmem>>, vector<16x128xf32>,
    return
  }
  func.func @transform_0(%arg0: i32) -> (i32, i32) {
    %c0_i32 = arith.constant 0 : i32
    %c0_i32_0 = arith.constant 0 : i32
    return %arg0, %c0_i32 : i32, i32
  }
  func.func @transform_1(%arg0: i32) -> (i32, i32) {
    %c0_i32 = arith.constant 0 : i32
    %c0_i32_0 = arith.constant 0 : i32
    %c0_i32_1 = arith.constant 0 : i32
    return %c0_i32, %c0_i32_0 : i32, i32
  }
  func.func @transform_2(%arg0: i32) -> (i32, i32) {
    %c0_i32 = arith.constant 0 : i32
    %c0_i32_0 = arith.constant 0 : i32
    %c0_i32_1 = arith.constant 0 : i32
    return %c0_i32, %c0_i32_0 : i32, i32
  }
  func.func @transform_3(%arg0: i32) -> (i32, i32) {
    %c0_i32 = arith.constant 0 : i32
    %c0_i32_0 = arith.constant 0 : i32
    return %arg0, %c0_i32 : i32, i32
  }
}

</mosaic_0001>

<bundles_post_ra>
// kernel: ffnn_forward.1
= control target key start
LH: loop header
LB: loop body
LE: loop exit
PB: predicated region body
PF: predicated region fallthrough
CT: control target
= control target key end

     0   :  { %vm21_vm0 = vcmask 64512   ;;  %s99_s1 = inlined_call_operand.vmem [shape: f32[8,128], index: 1, kind: input, shape index: {}]   ;;  %s100_s0 = inlined_call_operand.vmem [shape: f32[16,8], index: 0, kind: input, shape index: {}]   ;;  %s101_s2 = inlined_call_operand.vmem [shape: f32[1,128], index: 2, kind: input, shape index: {}]   ;;  %s102_s3 = inlined_call_operand.vmem [shape: f32[16,128], index: 3, kind: output, shape index: {}]  }
   0x1   :  { %v16_v0 = vld [vmem:[%s99_s1] sm:$0xff]  ;;  %v15_v2 = vld [vmem:[%s100_s0 + $0x8] sm:$0xff] }
   0x2   :  { %v14_v1 = vld [vmem:[%s100_s0] sm:$0xff]  ;;  %43 = vmatpush.msra.mxu0 %v16_v0  ;;  %59 = vmatpush.msra.mxu1 %v16_v0 }
   0x3   :  { %57 = vmatmul.msk.f32.vlgmr.msra.gmra.mxu0 %vm21_vm0, %v14_v1  ;;  %58 = vmatmul.msk.f32.vlgmr.msra.gmra.mxu1 %vm21_vm0, %v15_v2  ;;  %v60_v3 = vld [vmem:[%s101_s2] ss:$0 sm:$0xff] }
  0x80   :  { %v45_v4 = vpop.f32.mrf.mxu0  ;;  %v48_v5 = vpop.f32.mrf.mxu1 }
  0x81   :  { %v46_v6 = vadd.f32 %v60_v3, %v45_v4  ;;  %v49_v7 = vadd.f32 %v60_v3, %v48_v5 }
  0x83   :  { %51 = vst [vmem:[%s102_s3] sm:$0xff] %v46_v6 }
  0x84   :  { %52 = vst [vmem:[%s102_s3 + $0x8] sm:$0xff] %v49_v7 }

</bundles_post_ra>
